<compile_context>
chip_gen: v7x
topology: tpu7x:2x2x1
jax: 0.10.0
libtpu: 0.0.40
codegen_flags: <defaults>
</compile_context>

<pallas_src>
import functools

import numpy as np
import jax
import jax.numpy as jnp
from jax.experimental import pallas as pl
from jax.experimental.pallas import tpu as pltpu


def _round_up(x, m):
    return ((x + m - 1) // m) * m


# ------------------------------ fused kernel --------------------------------

def _clip_forward_kernel(pflat_ref, w_stack_ref, b_enc_ref, txt_ref, out_ref,
                         *, scale):
    """Fused CustomCLIP forward for one batch tile.

    pflat_ref:   (TB, PD) bf16  flattened patches (P*patch_dim, zero-padded PD)
    w_stack_ref: (PD, E)  bf16  tile(w_patch@w_proj / P, (P,1)), zero-padded
                                -> mean-pool folded into this matmul
    b_enc_ref:   (1, E)   f32   folded (b_patch @ w_proj), zero-padded
    txt_ref:     (E, K)   bf16  normalized text features^T, zero-padded (frozen)
    out_ref:     (TB, K)  bf16  logits, lane-dense (K padded to 128)
    scale:       python float   exp(logit_scale), applied post-matmul in f32
    """
    # Visual features (mean-pool + patch-embed + proj fused): one bf16 MXU
    # matmul with f32 accumulation, then f32 bias.
    feat = jnp.dot(pflat_ref[...], w_stack_ref[...],
                   preferred_element_type=jnp.float32)            # (TB, E)
    feat = feat + b_enc_ref[...]

    # L2 normalize in f32 (padded E lanes are exactly zero -> norm unaffected).
    inv_norm = jax.lax.rsqrt(
        jnp.sum(feat * feat, axis=-1, keepdims=True) + 1e-12)
    xn = feat * inv_norm

    # Cosine-similarity logits; logit scale applied in f32 post-matmul, then a
    # single bf16 cast for the lane-dense unmasked store.
    logits = jnp.dot(xn.astype(jnp.bfloat16), txt_ref[...],
                     preferred_element_type=jnp.float32)          # (TB, K)
    out_ref[...] = (scale * logits).astype(out_ref.dtype)


# --------------------------- pallas_call wrapper -----------------------------

def clip_forward_pallas(pflat, w_stack, b_enc, txt_t, *, batch_tile, scale):
    """pflat: (Bp, PD) bf16 (Bp % batch_tile == 0). Returns (Bp, K) bf16."""
    Bp, PD = pflat.shape
    E, K = txt_t.shape
    grid = (Bp // batch_tile,)
    kernel = functools.partial(_clip_forward_kernel, scale=float(scale))
    return pl.pallas_call(
        kernel,
        out_shape=jax.ShapeDtypeStruct((Bp, K), jnp.bfloat16),
        grid_spec=pltpu.PrefetchScalarGridSpec(
            num_scalar_prefetch=0,
            grid=grid,
            in_specs=[
                pl.BlockSpec((batch_tile, PD), lambda b: (b, 0)),
                pl.BlockSpec((PD, E), lambda b: (0, 0)),
                pl.BlockSpec((1, E), lambda b: (0, 0)),
                pl.BlockSpec((E, K), lambda b: (0, 0)),
            ],
            out_specs=pl.BlockSpec((batch_tile, K), lambda b: (b, 0)),
        ),
        compiler_params=pltpu.CompilerParams(
            dimension_semantics=("parallel",)),
    )(pflat, w_stack, b_enc, txt_t)


# ------------------------------ CustomCLIP -----------------------------------

class CustomCLIPPallas:
    """JAX/Pallas analogue of trainer/calip.py::CustomCLIP (inference forward)."""

    def __init__(self, key, *, num_classes=8, embed_dim=32, width=32,
                 in_channels=3, patch_size=4):
        k_txt, k_wp, k_bp, k_proj = jax.random.split(key, 4)
        self.patch_size = patch_size
        self.in_channels = in_channels
        self.num_classes = num_classes
        self.embed_dim = embed_dim

        patch_dim = in_channels * patch_size * patch_size
        self.patch_dim = patch_dim

        # --- frozen synthetic parameters (stand-ins for the CLIP checkpoint).
        t = jax.random.normal(k_txt, (num_classes, embed_dim), jnp.float32)
        text_features = t / jnp.linalg.norm(t, axis=-1, keepdims=True)
        logit_scale = jnp.float32(np.log(1.0 / 0.07))
        w_patch = 0.05 * jax.random.normal(k_wp, (patch_dim, width), jnp.float32)
        b_patch = 0.05 * jax.random.normal(k_bp, (1, width), jnp.float32)
        w_proj = 0.05 * jax.random.normal(k_proj, (width, embed_dim), jnp.float32)

        # raw f32 copies for the pure-JAX references
        self._text_features = text_features
        self._logit_scale = logit_scale
        self._w_patch, self._b_patch, self._w_proj = w_patch, b_patch, w_proj

        # --- fold everything frozen at init (done once, not per call) ---------
        self._w_enc_f32 = w_patch @ w_proj                         # (Dp, E)
        b_enc = b_patch @ w_proj                                   # (1, E)
        self.scale = float(jnp.exp(logit_scale))                   # applied in-kernel (f32)

        E = _round_up(embed_dim, 128)
        K = _round_up(num_classes, 128)
        self.e_pad, self.k_pad = E, K

        self.b_enc = jnp.pad(b_enc, ((0, 0), (0, E - embed_dim)))  # f32, resident
        self.txt_t = jnp.pad(
            text_features.T, ((0, E - embed_dim), (0, K - num_classes))
        ).astype(jnp.bfloat16)                                     # normalized, un-scaled

        # mean-pool-folded stacked weights depend on the patch count P (image
        # size); frozen, so cache per P.
        self._w_stack_cache = {}

    def _get_w_stack(self, P):
        if P not in self._w_stack_cache:
            PD = P * self.patch_dim
            PD_pad = _round_up(PD, 128)
            w_stack = jnp.tile(self._w_enc_f32 / P, (P, 1))        # (PD, E)
            w_stack = jnp.pad(
                w_stack,
                ((0, PD_pad - PD), (0, self.e_pad - self.embed_dim)))
            self._w_stack_cache[P] = w_stack.astype(jnp.bfloat16)
        return self._w_stack_cache[P]

    # --- glue: NCHW image -> (B, num_patches, C*ph*pw) patch vectors ---------
    def _patchify(self, image):
        B, C, H, W = image.shape
        p = self.patch_size
        x = image.reshape(B, C, H // p, p, W // p, p)
        x = jnp.transpose(x, (0, 2, 4, 1, 3, 5))          # B, Hp, Wp, C, p, p
        return x.reshape(B, (H // p) * (W // p), C * p * p)

    def __call__(self, image):
        B = image.shape[0]
        patches = self._patchify(image.astype(jnp.float32))        # (B, P, Dp)
        P = patches.shape[1]
        PD = P * self.patch_dim
        PD_pad = _round_up(PD, 128)
        w_stack = self._get_w_stack(P)

        # batch padding / tiling: multiple of 8; cap 512; keep >=2 grid steps
        # when the batch is big enough so v7x can shard across both cores.
        b_pad = _round_up(max(B, 1), 8)
        batch_tile = min(b_pad, 512)
        if b_pad >= 16:
            batch_tile = min(batch_tile, _round_up((b_pad + 1) // 2, 8))
        b_pad = _round_up(b_pad, batch_tile)

        # flatten patches (no per-patch DP pad) -> lane-dense contraction dim
        pflat = patches.astype(jnp.bfloat16).reshape(B, PD)
        pflat = jnp.pad(pflat, ((0, b_pad - B), (0, PD_pad - PD)))

        logits = clip_forward_pallas(pflat, w_stack, self.b_enc, self.txt_t,
                                     batch_tile=batch_tile,
                                     scale=self.scale)             # (b_pad, Kpad) bf16
        return logits[:B, :self.num_classes].astype(jnp.float32)

    # --- pure-JAX references --------------------------------------------------
    def reference_f32(self, image):
        patches = self._patchify(image.astype(jnp.float32))
        emb = jnp.einsum("bpd,dw->bpw", patches, self._w_patch) + self._b_patch
        pooled = jnp.mean(emb, axis=1)
        feat = pooled @ self._w_proj
        feat = feat / jnp.linalg.norm(feat, axis=-1, keepdims=True)
        return jnp.exp(self._logit_scale) * feat @ self._text_features.T

    def reference_matched(self, image):
        """Mirrors the kernel's intentional bf16-operand / f32-accumulate math."""
        patches = self._patchify(image.astype(jnp.float32))
        B, P, Dp = patches.shape
        pflat = patches.astype(jnp.bfloat16).reshape(B, P * Dp)
        w_stack = jnp.tile(self._w_enc_f32 / P, (P, 1)).astype(jnp.bfloat16)
        b_enc = self._b_patch @ self._w_proj
        feat = jnp.dot(pflat, w_stack,
                       preferred_element_type=jnp.float32) + b_enc
        xn = feat * jax.lax.rsqrt(
            jnp.sum(feat * feat, axis=-1, keepdims=True) + 1e-12)
        txt = self._text_features.T.astype(jnp.bfloat16)
        logits = jnp.dot(xn.astype(jnp.bfloat16), txt,
                         preferred_element_type=jnp.float32)
        return (self.scale * logits).astype(jnp.bfloat16).astype(jnp.float32)


# ----------------------------------- main ------------------------------------

if __name__ == "__main__":
    key = jax.random.PRNGKey(0)
    k_model, k_img = jax.random.split(key)

    model = CustomCLIPPallas(k_model, num_classes=8, embed_dim=32, width=32,
                             in_channels=3, patch_size=4)

    # image in NCHW, small shapes: batch=2, channels=3, spatial=16
    image = jax.random.normal(k_img, (2, 3, 16, 16), jnp.float32)

    logits = jax.block_until_ready(model(image))
    assert logits.shape == (2, 8), logits.shape

    # Check vs. a bf16-matched reference (same mixed-precision contract,
    # including the bf16 output store).
    ref_matched = jax.block_until_ready(model.reference_matched(image))
    assert np.allclose(np.asarray(logits), np.asarray(ref_matched),
                       rtol=1e-2, atol=1e-1), "mismatch vs bf16-matched reference"

    # Looser check vs. the full-f32 reference: tolerance accounts for the
    # intentional bf16 MXU operands / bf16 output (f32 accumulation) in kernel.
    ref_f32 = jax.block_until_ready(model.reference_f32(image))
    assert np.allclose(np.asarray(logits), np.asarray(ref_f32),
                       rtol=5e-2, atol=3e-1), "mismatch vs f32 reference"

    print("KERNEL_OK")
</pallas_src>

<mosaic_0001>
module attributes {stable_mosaic.version = 11 : i64} {
  func.func @_clip_forward_kernel(%arg0: i32, %arg1: memref<8x768xbf16, #tpu.memory_space<vmem>>, %arg2: memref<768x128xbf16, #tpu.memory_space<vmem>>, %arg3: memref<1x128xf32, #tpu.memory_space<vmem>>, %arg4: memref<128x128xbf16, #tpu.memory_space<vmem>>, %arg5: memref<8x128xbf16, #tpu.memory_space<vmem>>) attributes {dimension_semantics = [#tpu.dimension_semantics<parallel>], iteration_bounds = array<i64: 1>, scalar_prefetch = 0 : i64, scratch_operands = 0 : i64, tpu.core_type = #tpu.core_type<tc>, window_params = [{transform_indices = @transform_0, window_bounds = array<i64: 8, 768>}, {pipeline_mode = #tpu.pipeline_mode<synchronous>, transform_indices = @transform_1, window_bounds = array<i64: 768, 128>}, {pipeline_mode = #tpu.pipeline_mode<synchronous>, transform_indices = @transform_2, window_bounds = array<i64: 1, 128>}, {pipeline_mode = #tpu.pipeline_mode<synchronous>, transform_indices = @transform_3, window_bounds = array<i64: 128, 128>}, {transform_indices = @transform_4, window_bounds = array<i64: 8, 128>}]} {
    %c0 = arith.constant 0 : index
    %c0_0 = arith.constant 0 : index
    %0 = vector.load %arg1[%c0, %c0_0] : memref<8x768xbf16, #tpu.memory_space<vmem>>, vector<8x768xbf16>
    %c0_1 = arith.constant 0 : index
    %c0_2 = arith.constant 0 : index
    %1 = vector.load %arg2[%c0_1, %c0_2] : memref<768x128xbf16, #tpu.memory_space<vmem>>, vector<768x128xbf16>
    %cst = arith.constant dense<0.000000e+00> : vector<8x128xf32>
    %2 = tpu.matmul %0, %1, %cst {dimension_numbers = #tpu.dot_dimension_numbers<[1], [0], [0], [1], [0, 0, 1, 1], [], []>} : vector<8x768xbf16>, vector<768x128xbf16>, vector<8x128xf32> -> vector<8x128xf32>
    %c0_3 = arith.constant 0 : index
    %c0_4 = arith.constant 0 : index
    %3 = vector.load %arg3[%c0_3, %c0_4] : memref<1x128xf32, #tpu.memory_space<vmem>>, vector<1x128xf32>
    %4 = vector.broadcast %3 : vector<1x128xf32> to vector<8x128xf32>
    %5 = arith.addf %2, %4 : vector<8x128xf32>
    %6 = arith.mulf %5, %5 : vector<8x128xf32>
    %cst_5 = arith.constant dense<0.000000e+00> : vector<8xf32>
    %7 = vector.multi_reduction <add>, %6, %cst_5 [1] : vector<8x128xf32> to vector<8xf32>
    %8 = vector.shape_cast %7 : vector<8xf32> to vector<8x1xf32>
    %cst_6 = arith.constant 9.99999996E-13 : f32
    %9 = vector.broadcast %cst_6 : f32 to vector<8x1xf32>
    %10 = arith.addf %8, %9 : vector<8x1xf32>
    %11 = math.rsqrt %10 : vector<8x1xf32>
    %12 = vector.broadcast %11 : vector<8x1xf32> to vector<8x128xf32>
    %13 = arith.mulf %5, %12 : vector<8x128xf32>
    %14 = arith.truncf %13 : vector<8x128xf32> to vector<8x128xbf16>
    %c0_7 = arith.constant 0 : index
    %c0_8 = arith.constant 0 : index
    %15 = vector.load %arg4[%c0_7, %c0_8] : memref<128x128xbf16, #tpu.memory_space<vmem>>, vector<128x128xbf16>
    %cst_9 = arith.constant dense<0.000000e+00> : vector<8x128xf32>
    %16 = tpu.matmul %14, %15, %cst_9 {dimension_numbers = #tpu.dot_dimension_numbers<[1], [0], [0], [1], [0, 0, 1, 1], [], []>} : vector<8x128xbf16>, vector<128x128xbf16>, vector<8x128xf32> -> vector<8x128xf32>
    %cst_10 = arith.constant 14.2857141 : f32
    %17 = vector.broadcast %cst_10 : f32 to vector<8x128xf32>
    %18 = arith.mulf %17, %16 : vector<8x128xf32>
    %19 = arith.truncf %18 : vector<8x128xf32> to vector<8x128xbf16>
    %c0_11 = arith.constant 0 : index
    %c0_12 = arith.constant 0 : index
    %20 = vector.load %arg5[%c0_11, %c0_12] : memref<8x128xbf16, #tpu.memory_space<vmem>>, vector<8x128xbf16>
    tpu.vector_store %arg5[%c0_11, %c0_12], %19 {strides = array<i32>} : memref<8x128xbf16, #tpu.memory_space<vmem>>, vector<8x128xbf16>,
    return
  }
  func.func @transform_0(%arg0: i32) -> (i32, i32) {
    %c0_i32 = arith.constant 0 : i32
    %c0_i32_0 = arith.constant 0 : i32
    return %arg0, %c0_i32 : i32, i32
  }
  func.func @transform_1(%arg0: i32) -> (i32, i32) {
    %c0_i32 = arith.constant 0 : i32
    %c0_i32_0 = arith.constant 0 : i32
    %c0_i32_1 = arith.constant 0 : i32
    return %c0_i32, %c0_i32_0 : i32, i32
  }
  func.func @transform_2(%arg0: i32) -> (i32, i32) {
    %c0_i32 = arith.constant 0 : i32
    %c0_i32_0 = arith.constant 0 : i32
    %c0_i32_1 = arith.constant 0 : i32
    return %c0_i32, %c0_i32_0 : i32, i32
  }
  func.func @transform_3(%arg0: i32) -> (i32, i32) {
    %c0_i32 = arith.constant 0 : i32
    %c0_i32_0 = arith.constant 0 : i32
    %c0_i32_1 = arith.constant 0 : i32
    return %c0_i32, %c0_i32_0 : i32, i32
  }
  func.func @transform_4(%arg0: i32) -> (i32, i32) {
    %c0_i32 = arith.constant 0 : i32
    %c0_i32_0 = arith.constant 0 : i32
    return %arg0, %c0_i32 : i32, i32
  }
}

</mosaic_0001>

<bundles_post_ra>
// kernel: tpu_custom_call.1
= control target key start
LH: loop header
LB: loop body
LE: loop exit
PB: predicated region body
PF: predicated region fallthrough
CT: control target
= control target key end

     0   :  { %9 = vsyncpa [#allocation3], 0  ;;  %s1137_s0 = inlined_call_operand.hbm [shape: bf16[8,768], index: 0, kind: input, shape index: {}]   ;;  %s1138_s1 = inlined_call_operand.hbm [shape: bf16[768,128], index: 1, kind: input, shape index: {}]   ;;  %s1139_s2 = inlined_call_operand.vmem [shape: f32[1,128], index: 2, kind: input, shape index: {}]   ;;  %s1140_s3 = inlined_call_operand.hbm [shape: bf16[128,128], index: 3, kind: input, shape index: {}]   ;;  %s1141_s4 = inlined_call_operand.hbm [shape: bf16[8,128], index: 4, kind: output, shape index: {}]  }
   0x1   :  { %10 = vsyncpa [#allocation6], 0 }
   0x2   :  { %11 = vsyncpa [#allocation4], 0  ;;  %s1047_s15 = smov [#allocation5]   ;;  %s953_s19 = scalar_lea.hbm %s1138_s1, 6144 }
   0x3   :  { %s27_s16 = sshll.u32 %s1047_s15, 4  ;;  %p954_p0 = scmp.ne.s32.totalorder %s1138_s1, %s953_s19  ;;  %s28_s16 = int_to_ptr.vmem [resolvable:$true] %s27_s16 }
   0x4   :  { %p957_p1 = scmp.lt.u32.totalorder %s953_s19, %s1138_s1 }
   0x6   :  { %p959_p2 = pnand %p957_p1, %p954_p0 }
   0x8   :  { %962 = shalt.err (!%p959_p2)
}
   0x9   :  { %s963_s24 = scalar_lea.vmem %s28_s16, 6144  ;;  %p968_p4 = scmp.lt.s32.totalorder %s28_s16, %s28_s16 }
   0xa   :  { %p964_p3 = scmp.ne.s32.totalorder %s28_s16, %s963_s24  ;;  %p969_p5 = scmp.lt.s32.totalorder %s963_s24, %s963_s24 }
   0xc   :  { %p970_p6 = por %p969_p5, %p968_p4 }
   0xe   :  { %p971_p7 = pnand %p970_p6, %p964_p3 }
  0x10   :  { %974 = shalt.err (!%p971_p7)
}
  0x11   :  { %s1048_s25 = smov 64   ;;  %s1049_s26 = smov 4  }
  0x12   :  { %33 = dma.hbm_to_vmem [thread:$0]  %s1138_s1, 6144, %s28_s16, [#allocation6], %s1048_s25, %s1048_s25, %s1049_s26  }
  0x13   :  { %s1050_s29 = smov [#allocation2]   ;;  %s1051_s5 = smov [#allocation7]  }
  0x14   :  { %s18_s30 = sshll.u32 %s1050_s29, 4  ;;  %s41_s6 = sshll.u32 %s1051_s5, 4  ;;  %s19_s30 = int_to_ptr.vmem [resolvable:$true] %s18_s30  ;;  %s42_s6 = int_to_ptr.vmem [resolvable:$true] %s41_s6 }
  0x15   :  { %s975_s9 = scalar_lea.hbm %s1137_s0, 384 }
  0x16   :  { %p976_p8 = scmp.ne.s32.totalorder %s1137_s0, %s975_s9  ;;  %p979_p9 = scmp.lt.u32.totalorder %s975_s9, %s1137_s0 }
  0x18   :  { %p981_p10 = pnand %p979_p9, %p976_p8 }
  0x1a   :  { %984 = shalt.err (!%p981_p10)
}
  0x1b   :  { %s985_s1 = scalar_lea.vmem %s19_s30, 384  ;;  %p990_p12 = scmp.lt.s32.totalorder %s19_s30, %s19_s30 }
  0x1c   :  { %p986_p11 = scmp.ne.s32.totalorder %s19_s30, %s985_s1  ;;  %p991_p13 = scmp.lt.s32.totalorder %s985_s1, %s985_s1 }
  0x1e   :  { %p992_p0 = por %p991_p13, %p990_p12 }
  0x20   :  { %p993_p1 = pnand %p992_p0, %p986_p11 }
  0x22   :  { %996 = shalt.err (!%p993_p1)
}
  0x23   :  { %21 = dma.hbm_to_vmem [thread:$0]  %s1137_s0, 384, %s19_s30, [#allocation3]  }
  0x24   :  { %s997_s18 = scalar_lea.hbm %s1140_s3, 1024 }
  0x25   :  { %p998_p2 = scmp.ne.s32.totalorder %s1140_s3, %s997_s18  ;;  %p1001_p3 = scmp.lt.u32.totalorder %s997_s18, %s1140_s3 }
  0x27   :  { %p1003_p4 = pnand %p1001_p3, %p998_p2 }
  0x29   :  { %1006 = shalt.err (!%p1003_p4)
}
  0x2a   :  { %s1007_s23 = scalar_lea.vmem %s42_s6, 1024  ;;  %p1012_p6 = scmp.lt.s32.totalorder %s42_s6, %s42_s6 }
  0x2b   :  { %p1008_p5 = scmp.ne.s32.totalorder %s42_s6, %s1007_s23  ;;  %p1013_p7 = scmp.lt.s32.totalorder %s1007_s23, %s1007_s23 }
  0x2d   :  { %p1014_p8 = por %p1013_p7, %p1012_p6 }
  0x2f   :  { %p1015_p9 = pnand %p1014_p8, %p1008_p5 }
  0x31   :  { %1018 = shalt.err (!%p1015_p9)
}
  0x32   :  { %47 = dma.hbm_to_vmem [thread:$0]  %s1140_s3, 1024, %s42_s6, [#allocation6], %s1048_s25, %s1048_s25, %s1049_s26  }
  0x33   :  { %1041 = dma.done.wait [#allocation3], 384  }
  0x34   :  { %1042 = vsyncadd [#allocation3], 4294966912 }
  0x35   :  { %1043 = dma.done.wait [#allocation6], 7168  }
  0x36   :  { %1044 = vsyncadd [#allocation6], 4294960128  ;;  %v889_v0 = vld [vmem:[#allocation5 + $0x40] sm:$0xff]   ;;  %v893_v4 = vld [vmem:[#allocation5 + $0x48] sm:$0xff]   ;;  %v1052_v58 = vmov 0.0   ;;  %vm1053_vm0 = vmmov 0  }
  0x37   :  { %v890_v1 = vld [vmem:[#allocation5] sm:$0xff]   ;;  %786 = vmatprep.subr.bf16.mxu0 %v889_v0  ;;  %v894_v5 = vld [vmem:[#allocation5 + $0x8] sm:$0xff]   ;;  %v897_v8 = vld [vmem:[#allocation5 + $0x50] sm:$0xff]  }
  0x38   :  { %v891_v2 = vld [vmem:[#allocation5 + $0xc0] sm:$0xff]   ;;  %787 = vmatpush3.bf16.msra.mxu0 %v890_v1  ;;  %v895_v6 = vld [vmem:[#allocation5 + $0xc8] sm:$0xff]   ;;  %v898_v9 = vld [vmem:[#allocation5 + $0x10] sm:$0xff]  }
  0x39   :  { %v892_v3 = vld [vmem:[#allocation5 + $0x80] sm:$0xff]   ;;  %808 = vmatprep.subr.bf16.mxu1 %v891_v2  ;;  %788 = vmatprep.subr.bf16.mxu0 %v893_v4  ;;  %v896_v7 = vld [vmem:[#allocation5 + $0x88] sm:$0xff]   ;;  %v899_v10 = vld [vmem:[#allocation5 + $0xd0] sm:$0xff]  }
  0x3a   :  { %809 = vmatpush3.bf16.msra.mxu1 %v892_v3  ;;  %v900_v11 = vld [vmem:[#allocation5 + $0x90] sm:$0xff]   ;;  %v901_v12 = vld [vmem:[#allocation5 + $0x58] sm:$0xff]   ;;  %v905_v16 = vld [vmem:[#allocation5 + $0x60] sm:$0xff]  }
  0x3b   :  { %810 = vmatprep.subr.bf16.mxu1 %v895_v6  ;;  %v902_v13 = vld [vmem:[#allocation5 + $0x18] sm:$0xff]   ;;  %v906_v17 = vld [vmem:[#allocation5 + $0x20] sm:$0xff]   ;;  %v909_v20 = vld [vmem:[#allocation5 + $0x68] sm:$0xff]  }
  0x3c   :  { %789 = vmatpush3.bf16.msra.mxu0 %v894_v5  ;;  %v903_v14 = vld [vmem:[#allocation5 + $0xd8] sm:$0xff]   ;;  %v907_v18 = vld [vmem:[#allocation5 + $0xe0] sm:$0xff]   ;;  %v910_v21 = vld [vmem:[#allocation5 + $0x28] sm:$0xff]  }
  0x3d   :  { %790 = vmatprep.subr.bf16.mxu0 %v897_v8  ;;  %v904_v15 = vld [vmem:[#allocation5 + $0x98] sm:$0xff]   ;;  %v908_v19 = vld [vmem:[#allocation5 + $0xa0] sm:$0xff]   ;;  %v911_v22 = vld [vmem:[#allocation5 + $0xe8] sm:$0xff]  }
  0x3e   :  { %811 = vmatpush3.bf16.msra.mxu1 %v896_v7  ;;  %v912_v23 = vld [vmem:[#allocation5 + $0xa8] sm:$0xff]   ;;  %v913_v24 = vld [vmem:[#allocation5 + $0x70] sm:$0xff]   ;;  %v917_v28 = vld [vmem:[#allocation5 + $0x78] sm:$0xff]  }
  0x3f   :  { %812 = vmatprep.subr.bf16.mxu1 %v899_v10  ;;  %v914_v25 = vld [vmem:[#allocation5 + $0x30] sm:$0xff]   ;;  %v918_v29 = vld [vmem:[#allocation5 + $0x38] sm:$0xff]   ;;  %v58_v31 = vld [vmem:[#allocation2] sm:$0xff] }
  0x40   :  { %791 = vmatpush3.bf16.msra.mxu0 %v898_v9  ;;  %v915_v26 = vld [vmem:[#allocation5 + $0xf0] sm:$0xff]   ;;  %v919_v30 = vld [vmem:[#allocation5 + $0xf8] sm:$0xff]   ;;  %v724_v32 = vcombine.low %v58_v31, %v58_v31  ;;  %v725_v33 = vcombine.high %v58_v31, %v58_v31  ;;  %v923_v35 = vld [vmem:[#allocation5 + $0x140] sm:$0xff]  }
  0x41   :  { %792 = vmatprep.subr.bf16.mxu0 %v901_v12  ;;  %v916_v27 = vld [vmem:[#allocation5 + $0xb0] sm:$0xff]   ;;  %v922_v34 = vld [vmem:[#allocation5 + $0xb8] sm:$0xff]   ;;  %v926_v39 = vld [vmem:[#allocation5 + $0x100] sm:$0xff]  }
  0x42   :  { %813 = vmatpush3.bf16.msra.mxu1 %v900_v11  ;;  %v59_v36 = vld [vmem:[#allocation2 + $0x8] sm:$0xff]  ;;  %505 = vmatprep.mubr.bf16.mxu0 %v725_v33  ;;  %v927_v40 = vld [vmem:[#allocation5 + $0x148] sm:$0xff]   ;;  %v931_v44 = vld [vmem:[#allocation5 + $0x158] sm:$0xff]  }
  0x43   :  { %814 = vmatprep.subr.bf16.mxu1 %v903_v14  ;;  %v726_v37 = vcombine.low %v59_v36, %v59_v36  ;;  %v727_v38 = vcombine.high %v59_v36, %v59_v36  ;;  %v928_v41 = vld [vmem:[#allocation5 + $0x108] sm:$0xff]   ;;  %v929_v42 = vld [vmem:[#allocation5 + $0x150] sm:$0xff]   ;;  %v932_v45 = vld [vmem:[#allocation5 + $0x118] sm:$0xff]  }
  0x44   :  { %793 = vmatpush3.bf16.msra.mxu0 %v902_v13  ;;  %v930_v43 = vld [vmem:[#allocation5 + $0x110] sm:$0xff]   ;;  %v933_v46 = vld [vmem:[#allocation5 + $0x160] sm:$0xff]   ;;  %v935_v48 = vld [vmem:[#allocation5 + $0x168] sm:$0xff]  }
  0x45   :  { %794 = vmatprep.subr.bf16.mxu0 %v905_v16  ;;  %545 = vmatprep.mubr.bf16.mxu1 %v727_v38  ;;  %v934_v47 = vld [vmem:[#allocation5 + $0x120] sm:$0xff]   ;;  %v60_v49 = vld [vmem:[#allocation2 + $0x10] sm:$0xff]  ;;  %v936_v51 = vld [vmem:[#allocation5 + $0x128] sm:$0xff]  }
  0x46   :  { %815 = vmatpush3.bf16.msra.mxu1 %v904_v15  ;;  %v729_v50 = vcombine.high %v60_v49, %v60_v49  ;;  %v937_v52 = vld [vmem:[#allocation5 + $0x170] sm:$0xff]   ;;  %v939_v54 = vld [vmem:[#allocation5 + $0x178] sm:$0xff]   ;;  %v728_v56 = vcombine.low %v60_v49, %v60_v49  ;;  %v943_v57 = vld [vmem:[#allocation7] sm:$0xff]  }
  0x47   :  { %816 = vmatprep.subr.bf16.mxu1 %v907_v18  ;;  %v938_v53 = vld [vmem:[#allocation5 + $0x130] sm:$0xff]   ;;  %v940_v55 = vld [vmem:[#allocation5 + $0x138] sm:$0xff]   ;;  %v944_v59 = vld [vmem:[#allocation7 + $0x8] sm:$0xff]  }
  0x48   :  { %795 = vmatpush3.bf16.msra.mxu0 %v906_v17  ;;  %v945_v60 = vld [vmem:[#allocation7 + $0x10] sm:$0xff]   ;;  %v946_v61 = vld [vmem:[#allocation7 + $0x18] sm:$0xff]   ;;  %v723_v63 = vld [vmem:[%s1139_s2] ss:$0 sm:$0xff]  ;;  %s1054_s2 = smov [#allocation8]  }
  0x49   :  { %796 = vmatprep.subr.bf16.mxu0 %v909_v20  ;;  %v947_v18 = vld [vmem:[#allocation7 + $0x20] sm:$0xff]   ;;  %v949_v20 = vld [vmem:[#allocation7 + $0x30] sm:$0xff]   ;;  %s713_s26 = sshll.u32 %s1054_s2, 4  ;;  %s714_s26 = int_to_ptr.vmem [resolvable:$true] %s713_s26 }
  0x4a   :  { %817 = vmatpush3.bf16.msra.mxu1 %v908_v19  ;;  %v948_v19 = vld [vmem:[#allocation7 + $0x28] sm:$0xff]   ;;  %s1019_s27 = scalar_lea.vmem %s714_s26, 64  ;;  %p1024_p11 = scmp.lt.s32.totalorder %s714_s26, %s714_s26 }
  0x4b   :  { %818 = vmatprep.subr.bf16.mxu1 %v911_v22  ;;  %p1020_p10 = scmp.ne.s32.totalorder %s714_s26, %s1019_s27  ;;  %p1025_p12 = scmp.lt.s32.totalorder %s1019_s27, %s1019_s27 }
  0x4c   :  { %797 = vmatpush3.bf16.msra.mxu0 %v910_v21  ;;  %v950_v21 = vld [vmem:[#allocation7 + $0x38] sm:$0xff]  }
  0x4d   :  { %798 = vmatprep.subr.bf16.mxu0 %v913_v24  ;;  %p1026_p13 = por %p1025_p12, %p1024_p11 }
  0x4e   :  { %819 = vmatpush3.bf16.msra.mxu1 %v912_v23 }
  0x4f   :  { %820 = vmatprep.subr.bf16.mxu1 %v915_v26  ;;  %p1027_p0 = pnand %p1026_p13, %p1020_p10 }
  0x50   :  { %799 = vmatpush3.bf16.msra.mxu0 %v914_v25 }
  0x51   :  { %800 = vmatprep.subr.bf16.mxu0 %v917_v28 }
  0x52   :  { %821 = vmatpush3.bf16.msra.mxu1 %v916_v27 }
  0x53   :  { %822 = vmatprep.subr.bf16.mxu1 %v919_v30 }
  0x54   :  { %801 = vmatpush3.bf16.msra.mxu0 %v918_v29 }
  0x55   :  { %830 = vmatprep.subr.bf16.mxu0 %v923_v35 }
  0x56   :  { %823 = vmatpush3.bf16.msra.mxu1 %v922_v34 }
  0x57   :  { %506 = vmatmul.mubr.bf16.vlgmr.msra.gmra.mrb[0].mxu0 %v724_v32  ;;  %861 = vmatprep.subr.bf16.mxu1 %v1052_v58 }
  0x58   :  { %831 = vmatpush3.bf16.msra.mxu0 %v926_v39  ;;  %585 = vmatprep.mubr.bf16.mxu0 %v729_v50 }
  0x59   :  { %546 = vmatmul.mubr.bf16.vlgmr.msra.gmra.mrb[0].mxu1 %v726_v37  ;;  %832 = vmatprep.subr.bf16.mxu0 %v927_v40 }
  0x5a   :  { %862 = vmatpush3.bf16.msra.mxu1 %v943_v57  ;;  %877 = vmatprep.mubr.msk.bf16.mxu1 %vm1053_vm0, %v1052_v58 }
  0x5b   :  { %863 = vmatprep.subr.bf16.mxu1 %v1052_v58 }
  0x5c   :  { %833 = vmatpush3.bf16.msra.mxu0 %v928_v41 }
  0x5d   :  { %834 = vmatprep.subr.bf16.mxu0 %v929_v42 }
  0x5e   :  { %864 = vmatpush3.bf16.msra.mxu1 %v944_v59 }
  0x5f   :  { %865 = vmatprep.subr.bf16.mxu1 %v1052_v58 }
  0x60   :  { %835 = vmatpush3.bf16.msra.mxu0 %v930_v43 }
  0x61   :  { %836 = vmatprep.subr.bf16.mxu0 %v931_v44 }
  0x62   :  { %866 = vmatpush3.bf16.msra.mxu1 %v945_v60 }
  0x63   :  { %867 = vmatprep.subr.bf16.mxu1 %v1052_v58 }
  0x64   :  { %837 = vmatpush3.bf16.msra.mxu0 %v932_v45 }
  0x65   :  { %838 = vmatprep.subr.bf16.mxu0 %v933_v46 }
  0x66   :  { %868 = vmatpush3.bf16.msra.mxu1 %v946_v61 }
  0x67   :  { %869 = vmatprep.subr.bf16.mxu1 %v1052_v58 }
  0x68   :  { %839 = vmatpush3.bf16.msra.mxu0 %v934_v47 }
  0x69   :  { %840 = vmatprep.subr.bf16.mxu0 %v935_v48 }
  0x6a   :  { %870 = vmatpush3.bf16.msra.mxu1 %v947_v18 }
  0x6b   :  { %871 = vmatprep.subr.bf16.mxu1 %v1052_v58 }
  0x6c   :  { %841 = vmatpush3.bf16.msra.mxu0 %v936_v51 }
  0x6d   :  { %842 = vmatprep.subr.bf16.mxu0 %v937_v52 }
  0x6e   :  { %872 = vmatpush3.bf16.msra.mxu1 %v948_v19 }
  0x6f   :  { %873 = vmatprep.subr.bf16.mxu1 %v1052_v58 }
  0x70   :  { %843 = vmatpush3.bf16.msra.mxu0 %v938_v53 }
  0x71   :  { %844 = vmatprep.subr.bf16.mxu0 %v939_v54 }
  0x72   :  { %874 = vmatpush3.bf16.msra.mxu1 %v949_v20 }
  0x73   :  { %875 = vmatprep.subr.bf16.mxu1 %v1052_v58 }
  0x74   :  { %845 = vmatpush3.bf16.msra.mxu0 %v940_v55 }
  0x76   :  { %876 = vmatpush3.bf16.msra.mxu1 %v950_v21 }
  0x77   :  { %586 = vmatmul.mubr.bf16.vlgmr.msra.gmra.mrb[4].mxu0 %v728_v56 }
 0x12a   :  { %v802_v62 = vpop.f32.mrb[0].mxu0 }
 0x12b   :  { %v803_v0 = vpop.f32.mrb[1].mxu0 }
 0x12c   :  { %v804_v1 = vadd.f32 %v803_v0, %v802_v62  ;;  %v805_v2 = vpop.f32.mrb[2].mxu0  ;;  %v824_v3 = vpop.f32.mrb[0].mxu1 }
 0x12d   :  { %v806_v4 = vpop.f32.mrb[3].mxu0  ;;  %v825_v5 = vpop.f32.mrb[1].mxu1 }
 0x12e   :  { %v508_v6 = vadd.f32 %v804_v1, %v723_v63  ;;  %v826_v7 = vadd.f32 %v825_v5, %v824_v3  ;;  %v827_v8 = vpop.f32.mrb[2].mxu1 }
 0x12f   :  { %v828_v9 = vpop.f32.mrb[3].mxu1 }
 0x130   :  { %v548_v10 = vadd.f32 %v826_v7, %v508_v6 }
 0x14a   :  { %v846_v11 = vpop.f32.mrb[4].mxu0 }
 0x14b   :  { %v847_v12 = vpop.f32.mrb[5].mxu0 }
 0x14c   :  { %v848_v13 = vadd.f32 %v847_v12, %v846_v11  ;;  %v849_v14 = vpop.f32.mrb[6].mxu0 }
 0x14d   :  { %v850_v15 = vpop.f32.mrb[7].mxu0 }
 0x14e   :  { %v588_v16 = vadd.f32 %v848_v13, %v548_v10 }
 0x150   :  { %v593_v17 = vmul.f32 %v588_v16, %v588_v16 }
 0x152   :  { %594 = vadd.xlane.f32.xlu0 %v593_v17 }
 0x1df   :  { %v595_v22 = vpop.xlane.xlu0 %594 }
 0x1e0   :  { %v596_v23 = vadd.f32 1e-12, %v595_v22 }
 0x1e2   :  { %951 = vrsqrt.f32 %v596_v23 }
 0x1ec   :  { %v952_v24 = vpop.eup %951 }
 0x1ed   :  { %v598_v25 = vmul.f32 %v952_v24, %v588_v16 }
 0x1ef   :  { %v599_v26 = vpack.c.bf16 %v598_v25, %v598_v25 }
 0x1f1   :  { %878 = vmatmul.mubr.bf16.vlgmr.msra.gmra.mrb[4].mxu1 %v599_v26 }
 0x2c4   :  { %v698_v27 = vpop.f32.mrb[4].mxu1 }
 0x2c5   :  { %v704_v28 = vmul.f32 14.285714, %v698_v27  ;;  %v879_v29 = vpop.f32.mrb[5].mxu1 }
 0x2c6   :  { %v701_v30 = vpop.f32.mrb[6].mxu1 }
 0x2c7   :  { %v705_v31 = vpack.c.bf16 %v704_v28, %v704_v28  ;;  %v880_v32 = vpop.f32.mrb[7].mxu1 }
 0x2c9   :  { %706 = vst [vmem:[#allocation8] sm:$0xf] %v705_v31 }
 0x2ca   :  { %1030 = shalt.err (!%p1027_p0)
}
 0x2cb   :  { %s1031_s30 = scalar_lea.hbm %s1141_s4, 64 }
 0x2cc   :  { %p1032_p1 = scmp.ne.s32.totalorder %s1141_s4, %s1031_s30  ;;  %p1035_p2 = scmp.lt.u32.totalorder %s1031_s30, %s1141_s4 }
 0x2ce   :  { %p1037_p3 = pnand %p1035_p2, %p1032_p1 }
 0x2d0   :  { %1040 = shalt.err (!%p1037_p3)
}
 0x2d1   :  { %716 = dma.vmem_to_hbm [thread:$0]  %s714_s26, 64, %s1141_s4, [#allocation4]  }
 0x2d2   :  { %1045 = dma.done.wait [#allocation4], 64  }
 0x2d3   :  { %1046 = vsyncadd [#allocation4], 4294967232 }
 0x2d4   :  { %720 = vsyncpa [#allocation3], 1 }
 0x2d5   :  { %721 = vsyncpa [#allocation6], 1 }
 0x2d6   :  { %722 = vsyncpa [#allocation4], 1 }

</bundles_post_ra>
